<compile_context>
chip_gen: v5e
topology: v5e:2x2
jax: 0.10.0
libtpu: 0.0.40
codegen_flags: <defaults>
</compile_context>

<pallas_src>
import functools

import jax
import jax.numpy as jnp
from jax.experimental import pallas as pl
from jax.experimental.pallas import tpu as pltpu

_BN_EPS = 1e-5
_LANE = 128
_TILE_M_MAX = 1024


def _round_up(x, m):
    return (x + m - 1) // m * m


# ----------------------------------------------------------------------------
# Fused kernel: all prediction heads on one embedding tile.
# ----------------------------------------------------------------------------
def _fused_heads_kernel(x_ref, wdb_ref, bdb_ref, w1_ref, scale_ref, shift_ref,
                        w2_ref, b2_ref, o_ref, *,
                        n_dur, n_bin, c_sizes, out_pad, compute_dtype):
    n_db = n_dur + n_bin
    x_f32 = x_ref[...]                                  # (TM, E) f32, straight from HBM
    x_cd = x_f32.astype(compute_dtype)                  # in-kernel cast (no wrapper pass)

    # Duration + binary heads: tiny matmul kept fully in f32 (exp() amplifies
    # bf16 matmul error on the duration columns).
    y_db = jnp.dot(x_f32, wdb_ref[...], preferred_element_type=jnp.float32) + bdb_ref[...]
    dur = jnp.exp(y_db[:, :n_dur])                      # exp head
    binp = y_db[:, n_dur:n_db]                          # plain linear head

    # Stage 1 for every categorical task: one wide matmul; bias + BatchNorm
    # folded into a single scale/shift FMA, then ReLU.
    h = jnp.dot(x_cd, w1_ref[...], preferred_element_type=jnp.float32)
    h = jnp.maximum(h * scale_ref[...] + shift_ref[...], 0.0)

    # Stage 2: block-diagonal second layer => all categorical logits at once.
    logits = jnp.dot(h.astype(compute_dtype), w2_ref[...],
                     preferred_element_type=jnp.float32) + b2_ref[...]

    outs = [dur, binp]
    off = 0
    for c in c_sizes:                                   # unrolled at trace time
        lg = logits[:, off:off + c]                     # exact C_t-wide slice
        m = jnp.max(lg, axis=-1, keepdims=True)
        e = jnp.exp(lg - m)
        outs.append(e * pl.reciprocal(jnp.sum(e, axis=-1, keepdims=True),
                                      approx=True))
        off += c

    pad = out_pad - (n_db + off)
    if pad:
        outs.append(jnp.zeros((x_f32.shape[0], pad), jnp.float32))
    # Single lane-dense (TM, out_pad) store, in the (default bf16) output dtype.
    o_ref[...] = jnp.concatenate(outs, axis=1).astype(o_ref.dtype)


# ----------------------------------------------------------------------------
# Parameter construction (deterministic, synthetic). Linear weights stored
# pre-transposed as (in_dim, out_dim).
# ----------------------------------------------------------------------------
def _init_linear(key, in_dim, out_dim):
    kw, kb = jax.random.split(key)
    w = jax.random.normal(kw, (in_dim, out_dim), jnp.float32) * 0.05
    b = jax.random.normal(kb, (1, out_dim), jnp.float32) * 0.05
    return w, b


def init_predictor_params(key, config, num_cats):
    E = config["embedding_dim"]
    H = config["h_dim_decoder"]

    keys = jax.random.split(key, 2 + len(config["categorical_prediction_tasks"]))
    params = {}
    params["duration"] = _init_linear(keys[0], E, len(config["duration_prediction_tasks"]))
    params["binary"] = _init_linear(keys[1], E, len(config["binary_prediction_tasks"]))
    params["categorical"] = {}
    for i, task in enumerate(config["categorical_prediction_tasks"]):
        C = num_cats[task]
        k1, k2, k3 = jax.random.split(keys[2 + i], 3)
        w1, b1 = _init_linear(k1, E, H)
        w2, b2 = _init_linear(k2, H, C)
        kg, kb_, km, kv = jax.random.split(k3, 4)
        gamma = 1.0 + 0.1 * jax.random.normal(kg, (1, H), jnp.float32)
        beta = 0.1 * jax.random.normal(kb_, (1, H), jnp.float32)
        mean = 0.1 * jax.random.normal(km, (1, H), jnp.float32)
        var = jnp.abs(1.0 + 0.1 * jax.random.normal(kv, (1, H), jnp.float32))
        params["categorical"][task] = (w1, b1, gamma, beta, mean, var, w2, b2)
    return params


# ----------------------------------------------------------------------------
# Weight packing (trace-time layout plumbing, outside the kernel).
# ----------------------------------------------------------------------------
def _pack_params(params, config, compute_dtype):
    H = config["h_dim_decoder"]
    tasks = list(config["categorical_prediction_tasks"])
    n_dur = len(config["duration_prediction_tasks"])
    n_bin = len(config["binary_prediction_tasks"])
    n_db = n_dur + n_bin

    wd, bd = params["duration"]
    wb, bb = params["binary"]
    w_db = jnp.concatenate([wd, wb], axis=1)             # (E, n_db), stays f32
    b_db = jnp.concatenate([bd, bb], axis=1)             # (1, n_db)

    w1_list, scale_list, shift_list, w2_blocks, b2_list, c_sizes = [], [], [], [], [], []
    for t in tasks:
        (w1, b1, gamma, beta, mean, var, w2, b2) = params["categorical"][t]
        inv_std = gamma / jnp.sqrt(var + _BN_EPS)         # (1, H)
        w1_list.append(w1)
        scale_list.append(inv_std)
        shift_list.append((b1 - mean) * inv_std + beta)   # BN + bias folded
        w2_blocks.append(w2)
        b2_list.append(b2)
        c_sizes.append(int(w2.shape[1]))

    # Stage 1 (categorical): wide weight (E, T*H) streamed in compute_dtype.
    w_stage1 = jnp.concatenate(w1_list, axis=1)
    scale = jnp.concatenate(scale_list, axis=1)
    shift = jnp.concatenate(shift_list, axis=1)

    # Stage 2: block-diagonal second-layer weights (T*H, sum_C).
    sum_c = sum(c_sizes)
    w2_bd = jnp.zeros((len(tasks) * H, sum_c), jnp.float32)
    row = col = 0
    for w2 in w2_blocks:
        w2_bd = w2_bd.at[row:row + H, col:col + w2.shape[1]].set(w2)
        row += H
        col += w2.shape[1]
    b2_all = jnp.concatenate(b2_list, axis=1)

    return dict(
        w_db=w_db, b_db=b_db,
        w_stage1=w_stage1.astype(compute_dtype),
        scale=scale, shift=shift,
        w2_bd=w2_bd.astype(compute_dtype),
        b2_all=b2_all,
        meta=dict(n_dur=n_dur, n_bin=n_bin, n_db=n_db,
                  tasks=tasks, c_sizes=tuple(c_sizes), sum_c=sum_c),
    )


# ----------------------------------------------------------------------------
# Forward pass: one fused pallas_call over an N-grid.
# ----------------------------------------------------------------------------
def predictor_forward(params, embedding, config, *,
                      compute_dtype=jnp.bfloat16,
                      out_dtype=jnp.bfloat16,
                      tile_m_max=_TILE_M_MAX):
    N, E = embedding.shape
    packed = _pack_params(params, config, compute_dtype)
    meta = packed["meta"]
    total_out = meta["n_db"] + meta["sum_c"]
    out_pad = _round_up(total_out, _LANE)

    # Row tiling: multiple of 16 (bf16 sublane packing), capped at tile_m_max,
    # and for mid-size N capped near N/2 so the "parallel" grid has >= 2 steps
    # (feeds both v7x TensorCores). Ragged last block handled by Pallas.
    tile_m = min(tile_m_max,
                 max(16, _round_up(pl.cdiv(N, 2), 16)),
                 max(16, _round_up(N, 16)))
    grid_m = pl.cdiv(N, tile_m)

    kernel = functools.partial(
        _fused_heads_kernel,
        n_dur=meta["n_dur"], n_bin=meta["n_bin"],
        c_sizes=meta["c_sizes"], out_pad=out_pad,
        compute_dtype=compute_dtype)

    def full(arr):  # small weights: full-extent, resident across the grid
        return pl.BlockSpec(arr.shape, lambda i: (0, 0))

    weights = (packed["w_db"], packed["b_db"], packed["w_stage1"],
               packed["scale"], packed["shift"], packed["w2_bd"], packed["b2_all"])

    # VMEM budget from the real (double-buffered) footprint + headroom rather
    # than a flat number; keeps us honest under v7x's 64 MiB VMEM.
    # (If the packed weights ever get large, single-buffer them via
    #  pipeline_mode=pl.Buffered(1) on the full() specs.)
    out_isize = jnp.dtype(out_dtype).itemsize
    weight_bytes = sum(int(w.size) * jnp.dtype(w.dtype).itemsize for w in weights)
    footprint = (2 * tile_m * E * 4                       # streamed f32 embedding
                 + 2 * tile_m * out_pad * out_isize       # output tile
                 + 2 * weight_bytes                       # default double-buffered
                 + tile_m * (out_pad * 8                  # slab temporaries (f32)
                             + meta["sum_c"] * 4
                             + len(meta["tasks"]) * config["h_dim_decoder"] * 4))
    vmem_limit = int(min(64 * 1024 * 1024, max(16 * 1024 * 1024, 2 * footprint)))

    slab = pl.pallas_call(
        kernel,
        out_shape=jax.ShapeDtypeStruct((N, out_pad), out_dtype),
        grid_spec=pltpu.PrefetchScalarGridSpec(
            num_scalar_prefetch=0,
            grid=(grid_m,),
            in_specs=[pl.BlockSpec((tile_m, E), lambda i: (i, 0))]  # streamed embedding
                     + [full(w) for w in weights],
            out_specs=pl.BlockSpec((tile_m, out_pad), lambda i: (i, 0)),
        ),
        compiler_params=pltpu.CompilerParams(
            dimension_semantics=("parallel",),
            vmem_limit_bytes=vmem_limit,
        ),
    )(embedding, *weights)

    # Wrapper-side slicing / reshaping of the lane-dense slab (free plumbing).
    max_seq_len = config["max_seq_len"]
    n_dur, n_bin, n_db = meta["n_dur"], meta["n_bin"], meta["n_db"]
    dur = slab[:, :n_dur].reshape(-1, max_seq_len, n_dur)
    binp = slab[:, n_dur:n_db].reshape(-1, max_seq_len, n_bin)
    cat = {}
    off = n_db
    for task, c in zip(meta["tasks"], meta["c_sizes"]):
        cat[task] = slab[:, off:off + c].reshape(-1, max_seq_len, c)
        off += c
    return dur, binp, cat


# ----------------------------------------------------------------------------
# Pure-JAX reference (for correctness sanity check)
# ----------------------------------------------------------------------------
def predictor_forward_ref(params, embedding, config):
    max_seq_len = config["max_seq_len"]
    wd, bd = params["duration"]
    dur = jnp.exp(embedding @ wd + bd).reshape(-1, max_seq_len, wd.shape[1])
    wb, bb = params["binary"]
    binp = (embedding @ wb + bb).reshape(-1, max_seq_len, wb.shape[1])
    cat = {}
    for task, p in params["categorical"].items():
        (w1, b1, gamma, beta, mean, var, w2, b2) = p
        h = embedding @ w1 + b1
        h = (h - mean) / jnp.sqrt(var + _BN_EPS) * gamma + beta
        h = jnp.maximum(h, 0.0)
        logits = h @ w2 + b2
        cat[task] = jax.nn.softmax(logits, axis=-1).reshape(-1, max_seq_len, w2.shape[1])
    return dur, binp, cat


# ----------------------------------------------------------------------------
if __name__ == "__main__":
    config = {
        "embedding_dim": 32,
        "h_dim_decoder": 32,
        "max_seq_len": 8,
        "dropout": 0.1,                      # identity in eval mode
        "fc_activate_fn": "relu",
        "duration_prediction_tasks": ["dur_a", "dur_b"],          # 2
        "binary_prediction_tasks": ["bin_a", "bin_b", "bin_c"],   # 3
        "categorical_prediction_tasks": ["cat_a", "cat_b"],
    }
    num_cats = {"cat_a": 5, "cat_b": 7}

    batch = 2
    N = batch * config["max_seq_len"]            # 16
    E = config["embedding_dim"]                  # 32

    key = jax.random.PRNGKey(0)
    k_params, k_x = jax.random.split(key)
    params = init_predictor_params(k_params, config, num_cats)
    embedding = jax.random.normal(k_x, (N, E), jnp.float32)

    dur_r, bin_r, cat_r = predictor_forward_ref(params, embedding, config)

    # Fast path: bf16 streaming weights, bf16 output slab, approx reciprocal.
    dur, binp, cat = predictor_forward(params, embedding, config,
                                       compute_dtype=jnp.bfloat16,
                                       out_dtype=jnp.bfloat16)
    jax.block_until_ready((dur, binp, cat))
    assert dur.shape == (batch, config["max_seq_len"], 2)
    assert binp.shape == (batch, config["max_seq_len"], 3)
    assert jnp.allclose(dur, dur_r, atol=2e-2, rtol=2e-2)
    assert jnp.allclose(binp, bin_r, atol=2e-2, rtol=2e-2)
    for task in cat:
        assert cat[task].shape == (batch, config["max_seq_len"], num_cats[task])
        assert jnp.allclose(cat[task], cat_r[task], atol=2e-2, rtol=2e-2)

    # Tighter numerics check with f32 compute + f32 output (approx reciprocal
    # is the only remaining loosener, ~1e-4 relative on softmax rows).
    dur32, bin32, cat32 = predictor_forward(params, embedding, config,
                                            compute_dtype=jnp.float32,
                                            out_dtype=jnp.float32)
    jax.block_until_ready((dur32, bin32, cat32))
    assert jnp.allclose(dur32, dur_r, atol=1e-3, rtol=1e-3)
    assert jnp.allclose(bin32, bin_r, atol=1e-3, rtol=1e-3)
    for task in cat32:
        assert jnp.allclose(cat32[task], cat_r[task], atol=1e-3, rtol=1e-3)

    print("KERNEL_OK")
</pallas_src>

<mosaic_0001>
module attributes {stable_mosaic.version = 11 : i64} {
  func.func @_fused_heads_kernel(%arg0: i32, %arg1: memref<16x32xf32, #tpu.memory_space<vmem>>, %arg2: memref<32x5xf32, #tpu.memory_space<vmem>>, %arg3: memref<1x5xf32, #tpu.memory_space<vmem>>, %arg4: memref<32x64xbf16, #tpu.memory_space<vmem>>, %arg5: memref<1x64xf32, #tpu.memory_space<vmem>>, %arg6: memref<1x64xf32, #tpu.memory_space<vmem>>, %arg7: memref<64x12xbf16, #tpu.memory_space<vmem>>, %arg8: memref<1x12xf32, #tpu.memory_space<vmem>>, %arg9: memref<16x128xbf16, #tpu.memory_space<vmem>>) attributes {dimension_semantics = [#tpu.dimension_semantics<parallel>], iteration_bounds = array<i64: 1>, scalar_prefetch = 0 : i64, scratch_operands = 0 : i64, tpu.core_type = #tpu.core_type<tc>, window_params = [{transform_indices = @transform_0, window_bounds = array<i64: 16, 32>}, {pipeline_mode = #tpu.pipeline_mode<synchronous>, transform_indices = @transform_1, window_bounds = array<i64: 32, 5>}, {pipeline_mode = #tpu.pipeline_mode<synchronous>, transform_indices = @transform_2, window_bounds = array<i64: 1, 5>}, {pipeline_mode = #tpu.pipeline_mode<synchronous>, transform_indices = @transform_3, window_bounds = array<i64: 32, 64>}, {pipeline_mode = #tpu.pipeline_mode<synchronous>, transform_indices = @transform_4, window_bounds = array<i64: 1, 64>}, {pipeline_mode = #tpu.pipeline_mode<synchronous>, transform_indices = @transform_5, window_bounds = array<i64: 1, 64>}, {pipeline_mode = #tpu.pipeline_mode<synchronous>, transform_indices = @transform_6, window_bounds = array<i64: 64, 12>}, {pipeline_mode = #tpu.pipeline_mode<synchronous>, transform_indices = @transform_7, window_bounds = array<i64: 1, 12>}, {transform_indices = @transform_8, window_bounds = array<i64: 16, 128>}]} {
    %c0 = arith.constant 0 : index
    %c0_0 = arith.constant 0 : index
    %0 = vector.load %arg1[%c0, %c0_0] : memref<16x32xf32, #tpu.memory_space<vmem>>, vector<16x32xf32>
    %1 = arith.truncf %0 : vector<16x32xf32> to vector<16x32xbf16>
    %c0_1 = arith.constant 0 : index
    %c0_2 = arith.constant 0 : index
    %2 = vector.load %arg2[%c0_1, %c0_2] : memref<32x5xf32, #tpu.memory_space<vmem>>, vector<32x5xf32>
    %cst = arith.constant dense<0.000000e+00> : vector<16x5xf32>
    %3 = tpu.matmul %0, %2, %cst {dimension_numbers = #tpu.dot_dimension_numbers<[1], [0], [0], [1], [0, 0, 1, 1], [], []>} : vector<16x32xf32>, vector<32x5xf32>, vector<16x5xf32> -> vector<16x5xf32>
    %c0_3 = arith.constant 0 : index
    %c0_4 = arith.constant 0 : index
    %4 = vector.load %arg3[%c0_3, %c0_4] : memref<1x5xf32, #tpu.memory_space<vmem>>, vector<1x5xf32>
    %5 = vector.broadcast %4 : vector<1x5xf32> to vector<16x5xf32>
    %6 = arith.addf %3, %5 : vector<16x5xf32>
    %7 = vector.extract_strided_slice %6 {offsets = [0, 0], sizes = [16, 2], strides = [1, 1]} : vector<16x5xf32> to vector<16x2xf32>
    %8 = math.exp %7 : vector<16x2xf32>
    %9 = vector.extract_strided_slice %6 {offsets = [0, 2], sizes = [16, 3], strides = [1, 1]} : vector<16x5xf32> to vector<16x3xf32>
    %c0_5 = arith.constant 0 : index
    %c0_6 = arith.constant 0 : index
    %10 = vector.load %arg4[%c0_5, %c0_6] : memref<32x64xbf16, #tpu.memory_space<vmem>>, vector<32x64xbf16>
    %cst_7 = arith.constant dense<0.000000e+00> : vector<16x64xf32>
    %11 = tpu.matmul %1, %10, %cst_7 {dimension_numbers = #tpu.dot_dimension_numbers<[1], [0], [0], [1], [0, 0, 1, 1], [], []>} : vector<16x32xbf16>, vector<32x64xbf16>, vector<16x64xf32> -> vector<16x64xf32>
    %c0_8 = arith.constant 0 : index
    %c0_9 = arith.constant 0 : index
    %12 = vector.load %arg5[%c0_8, %c0_9] : memref<1x64xf32, #tpu.memory_space<vmem>>, vector<1x64xf32>
    %13 = vector.broadcast %12 : vector<1x64xf32> to vector<16x64xf32>
    %14 = arith.mulf %11, %13 : vector<16x64xf32>
    %c0_10 = arith.constant 0 : index
    %c0_11 = arith.constant 0 : index
    %15 = vector.load %arg6[%c0_10, %c0_11] : memref<1x64xf32, #tpu.memory_space<vmem>>, vector<1x64xf32>
    %16 = vector.broadcast %15 : vector<1x64xf32> to vector<16x64xf32>
    %17 = arith.addf %14, %16 : vector<16x64xf32>
    %cst_12 = arith.constant 0.000000e+00 : f32
    %18 = vector.broadcast %cst_12 : f32 to vector<16x64xf32>
    %19 = arith.maximumf %17, %18 : vector<16x64xf32>
    %20 = arith.truncf %19 : vector<16x64xf32> to vector<16x64xbf16>
    %c0_13 = arith.constant 0 : index
    %c0_14 = arith.constant 0 : index
    %21 = vector.load %arg7[%c0_13, %c0_14] : memref<64x12xbf16, #tpu.memory_space<vmem>>, vector<64x12xbf16>
    %cst_15 = arith.constant dense<0.000000e+00> : vector<16x12xf32>
    %22 = tpu.matmul %20, %21, %cst_15 {dimension_numbers = #tpu.dot_dimension_numbers<[1], [0], [0], [1], [0, 0, 1, 1], [], []>} : vector<16x64xbf16>, vector<64x12xbf16>, vector<16x12xf32> -> vector<16x12xf32>
    %c0_16 = arith.constant 0 : index
    %c0_17 = arith.constant 0 : index
    %23 = vector.load %arg8[%c0_16, %c0_17] : memref<1x12xf32, #tpu.memory_space<vmem>>, vector<1x12xf32>
    %24 = vector.broadcast %23 : vector<1x12xf32> to vector<16x12xf32>
    %25 = arith.addf %22, %24 : vector<16x12xf32>
    %26 = vector.extract_strided_slice %25 {offsets = [0, 0], sizes = [16, 5], strides = [1, 1]} : vector<16x12xf32> to vector<16x5xf32>
    %cst_18 = arith.constant dense<0xFF800000> : vector<16xf32>
    %27 = vector.multi_reduction <maximumf>, %26, %cst_18 [1] : vector<16x5xf32> to vector<16xf32>
    %28 = vector.shape_cast %27 : vector<16xf32> to vector<16x1xf32>
    %29 = vector.broadcast %28 : vector<16x1xf32> to vector<16x5xf32>
    %30 = arith.subf %26, %29 : vector<16x5xf32>
    %31 = math.exp %30 : vector<16x5xf32>
    %cst_19 = arith.constant dense<0.000000e+00> : vector<16xf32>
    %32 = vector.multi_reduction <add>, %31, %cst_19 [1] : vector<16x5xf32> to vector<16xf32>
    %33 = vector.shape_cast %32 : vector<16xf32> to vector<16x1xf32>
    %34 = tpu.reciprocal %33 {approx = true} : vector<16x1xf32> -> vector<16x1xf32>
    %35 = vector.broadcast %34 : vector<16x1xf32> to vector<16x5xf32>
    %36 = arith.mulf %31, %35 : vector<16x5xf32>
    %37 = vector.extract_strided_slice %25 {offsets = [0, 5], sizes = [16, 7], strides = [1, 1]} : vector<16x12xf32> to vector<16x7xf32>
    %cst_20 = arith.constant dense<0xFF800000> : vector<16xf32>
    %38 = vector.multi_reduction <maximumf>, %37, %cst_20 [1] : vector<16x7xf32> to vector<16xf32>
    %39 = vector.shape_cast %38 : vector<16xf32> to vector<16x1xf32>
    %40 = vector.broadcast %39 : vector<16x1xf32> to vector<16x7xf32>
    %41 = arith.subf %37, %40 : vector<16x7xf32>
    %42 = math.exp %41 : vector<16x7xf32>
    %cst_21 = arith.constant dense<0.000000e+00> : vector<16xf32>
    %43 = vector.multi_reduction <add>, %42, %cst_21 [1] : vector<16x7xf32> to vector<16xf32>
    %44 = vector.shape_cast %43 : vector<16xf32> to vector<16x1xf32>
    %45 = tpu.reciprocal %44 {approx = true} : vector<16x1xf32> -> vector<16x1xf32>
    %46 = vector.broadcast %45 : vector<16x1xf32> to vector<16x7xf32>
    %47 = arith.mulf %42, %46 : vector<16x7xf32>
    %cst_22 = arith.constant 0.000000e+00 : f32
    %48 = vector.broadcast %cst_22 : f32 to vector<16x111xf32>
    %49 = tpu.concatenate %8, %9, %36, %47, %48 in 1 : vector<16x2xf32>, vector<16x3xf32>, vector<16x5xf32>, vector<16x7xf32>, vector<16x111xf32> -> vector<16x128xf32>
    %50 = arith.truncf %49 : vector<16x128xf32> to vector<16x128xbf16>
    %c0_23 = arith.constant 0 : index
    %c0_24 = arith.constant 0 : index
    %51 = vector.load %arg9[%c0_23, %c0_24] : memref<16x128xbf16, #tpu.memory_space<vmem>>, vector<16x128xbf16>
    tpu.vector_store %arg9[%c0_23, %c0_24], %50 {strides = array<i32>} : memref<16x128xbf16, #tpu.memory_space<vmem>>, vector<16x128xbf16>,
    return
  }
  func.func @transform_0(%arg0: i32) -> (i32, i32) {
    %c0_i32 = arith.constant 0 : i32
    %c0_i32_0 = arith.constant 0 : i32
    return %arg0, %c0_i32 : i32, i32
  }
  func.func @transform_1(%arg0: i32) -> (i32, i32) {
    %c0_i32 = arith.constant 0 : i32
    %c0_i32_0 = arith.constant 0 : i32
    %c0_i32_1 = arith.constant 0 : i32
    return %c0_i32, %c0_i32_0 : i32, i32
  }
  func.func @transform_2(%arg0: i32) -> (i32, i32) {
    %c0_i32 = arith.constant 0 : i32
    %c0_i32_0 = arith.constant 0 : i32
    %c0_i32_1 = arith.constant 0 : i32
    return %c0_i32, %c0_i32_0 : i32, i32
  }
  func.func @transform_3(%arg0: i32) -> (i32, i32) {
    %c0_i32 = arith.constant 0 : i32
    %c0_i32_0 = arith.constant 0 : i32
    %c0_i32_1 = arith.constant 0 : i32
    return %c0_i32, %c0_i32_0 : i32, i32
  }
  func.func @transform_4(%arg0: i32) -> (i32, i32) {
    %c0_i32 = arith.constant 0 : i32
    %c0_i32_0 = arith.constant 0 : i32
    %c0_i32_1 = arith.constant 0 : i32
    return %c0_i32, %c0_i32_0 : i32, i32
  }
  func.func @transform_5(%arg0: i32) -> (i32, i32) {
    %c0_i32 = arith.constant 0 : i32
    %c0_i32_0 = arith.constant 0 : i32
    %c0_i32_1 = arith.constant 0 : i32
    return %c0_i32, %c0_i32_0 : i32, i32
  }
  func.func @transform_6(%arg0: i32) -> (i32, i32) {
    %c0_i32 = arith.constant 0 : i32
    %c0_i32_0 = arith.constant 0 : i32
    %c0_i32_1 = arith.constant 0 : i32
    return %c0_i32, %c0_i32_0 : i32, i32
  }
  func.func @transform_7(%arg0: i32) -> (i32, i32) {
    %c0_i32 = arith.constant 0 : i32
    %c0_i32_0 = arith.constant 0 : i32
    %c0_i32_1 = arith.constant 0 : i32
    return %c0_i32, %c0_i32_0 : i32, i32
  }
  func.func @transform_8(%arg0: i32) -> (i32, i32) {
    %c0_i32 = arith.constant 0 : i32
    %c0_i32_0 = arith.constant 0 : i32
    return %arg0, %c0_i32 : i32, i32
  }
}

</mosaic_0001>

<bundles_post_ra>
// kernel: tpu_custom_call.1
= control target key start
LH: loop header
LB: loop body
LE: loop exit
PB: predicated region body
PF: predicated region fallthrough
CT: control target
= control target key end

     0   :  { %s504_s0 = inlined_call_operand.vmem [shape: f32[16,32], index: 0, kind: input, shape index: {}]   ;;  %s505_s1 = inlined_call_operand.vmem [shape: f32[32,5], index: 1, kind: input, shape index: {}]   ;;  %s506_s2 = inlined_call_operand.vmem [shape: f32[1,5], index: 2, kind: input, shape index: {}]   ;;  %s507_s3 = inlined_call_operand.vmem [shape: bf16[32,64], index: 3, kind: input, shape index: {}]   ;;  %s508_s4 = inlined_call_operand.vmem [shape: f32[1,64], index: 4, kind: input, shape index: {}]   ;;  %s509_s5 = inlined_call_operand.vmem [shape: f32[1,64], index: 5, kind: input, shape index: {}]   ;;  %s510_s6 = inlined_call_operand.vmem [shape: bf16[64,12], index: 6, kind: input, shape index: {}]   ;;  %s511_s7 = inlined_call_operand.vmem [shape: f32[1,12], index: 7, kind: input, shape index: {}]   ;;  %s512_s8 = inlined_call_operand.hbm [shape: bf16[16,128], index: 8, kind: output, shape index: {}]  }
   0x1   :  { %v311_v0 = vld [vmem:[%s507_s3 + $0x8] sm:$0xff]  ;;  %v310_v1 = vld [vmem:[%s507_s3] sm:$0xff] }
   0x2   :  { %v445_v2 = vld [vmem:[%s504_s0] sm:$0xff]  ;;  %v450_v3 = vld [vmem:[%s504_s0 + $0x8] sm:$0xff]  ;;  %101 = vmatpush.bf16.msra.mxu1 %v311_v0 }
   0x3   :  { %13 = vsyncpa [#allocation3], 0  ;;  %v33_v4 = vpack.c.bf16 %v450_v3, %v445_v2  ;;  %vm42_vm0 = vcmask 261120   ;;  %v315_v5 = vld [vmem:[%s510_s6 + $0x18] sm:$0xff]  ;;  %v314_v6 = vld [vmem:[%s510_s6 + $0x10] sm:$0xff]  ;;  %vm160_vm1 = vcmask 523264  }
   0x4   :  { %168 = vmatpush.bf16.msra.mxu2 %v315_v5  ;;  %v313_v7 = vld [vmem:[%s510_s6 + $0x8] sm:$0xff]  ;;  %v312_v8 = vld [vmem:[%s510_s6] sm:$0xff]  ;;  %vm201_vm2 = vcmask 97320   ;;  %vm178_vm3 = vcmask 39936   ;;  %v37_v47 = vld [vmem:[%s505_s1 + $0x18] sm:$0xff]  ;;  %vm222_vm4 = vcmask 56320  }
   0x5   :  { %v336_v10 = vld [vmem:[%s508_s4] ss:$0 sm:$0xff]  ;;  %s386_s4 = smov 123   ;;  %61 = vmatpush.msra.mxu0 %v37_v47  ;;  %v36_v48 = vld [vmem:[%s505_s1 + $0x10] sm:$0xff]  ;;  %v35_v49 = vld [vmem:[%s505_s1 + $0x8] sm:$0xff]  ;;  %vm249_vm5 = vcmask 15360  }
   0x6   :  { %102 = vmatpush.bf16.msra.mxu1 %v310_v1  ;;  %v337_v12 = vld [vmem:[%s509_s5] ss:$0 sm:$0xff]  ;;  %vm254_vm6 = vcmask 80896   ;;  %vm257_vm7 = vcmask 138240   ;;  %s270_s3 = sshll.u32 %s512_s8, 4  ;;  %s389_s13 = smov 64   ;;  %s271_s3 = int_to_ptr.hbm [resolvable:$true] %s270_s3 }
   0x7   :  { %v338_v20 = vld [vmem:[%s511_s7] ss:$0 sm:$0xff]  ;;  %62 = vmatpush.msra.mxu0 %v36_v48  ;;  %s390_s14 = smov 4  }
   0x8   :  { %169 = vmatpush.bf16.msra.mxu2 %v314_v6  ;;  %v34_v50 = vld [vmem:[%s505_s1] sm:$0xff]  ;;  %s387_s1 = smov 5  }
   0x9   :  { %292 = vmatmul.msk.bf16.vlgmr.msra.gmra.mxu1 %vm42_vm0, %v33_v4  ;;  %63 = vmatpush.msra.mxu0 %v35_v49  ;;  %v339_v6 = vld [vmem:[%s506_s2] ss:$0 sm:$0xff]  ;;  %s388_s2 = smov [#allocation2]  }
   0xa   :  { %s268_s10 = sshll.u32 %s388_s2, 4  ;;  %s269_s10 = int_to_ptr.vmem [resolvable:$true] %s268_s10 }
   0xb   :  { %64 = vmatpush.msra.mxu0 %v34_v50 }
   0xc   :  { %170 = vmatpush.bf16.msra.mxu2 %v313_v7  ;;  %282 = vmatmul.msk.f32.vlgmr.msra.gmra.mxu0 %vm42_vm0, %v445_v2 }
  0x10   :  { %171 = vmatpush.bf16.msra.mxu2 %v312_v8 }
  0x14   :  { %283 = vmatmul.msk.f32.gmra.mxu0 %vm42_vm0, %v450_v3 }
  0x86   :  { %v104_v9 = vpop.f32.mrf.mxu1 }
  0x87   :  { %v113_v11 = vmul.f32 %v336_v10, %v104_v9 }
  0x89   :  { %v119_v14 = vadd.f32 %v337_v12, %v113_v11  ;;  %v66_v5 = vpop.f32.mrf.mxu0 }
  0x8a   :  { %v67_v8 = vadd.f32 %v339_v6, %v66_v5 }
  0x8b   :  { %v121_v17 = vmax.f32 %v119_v14, 0.0 }
  0x8e   :  { %v106_v13 = vpop.f32.mrf.mxu1 }
  0x8f   :  { %v114_v15 = vmul.f32 %v336_v10, %v106_v13  ;;  %v72_v10 = vmul.f32 1.442695, %v67_v8 }
  0x91   :  { %v120_v16 = vadd.f32 %v337_v12, %v114_v15  ;;  %v69_v7 = vpop.f32.mrf.mxu0 }
  0x92   :  { %v70_v9 = vadd.f32 %v339_v6, %v69_v7 }
  0x93   :  { %v122_v18 = vmax.f32 %v120_v16, 0.0 }
  0x94   :  { %v74_v11 = vmul.f32 1.442695, %v70_v9 }
  0x95   :  { %v123_v19 = vpack.c.bf16 %v122_v18, %v121_v17 }
  0x97   :  { %309 = vmatmul.msk.bf16.vlgmr.msra.gmra.mxu2 %vm160_vm1, %v123_v19 }
 0x11a   :  { %v173_v21 = vpop.f32.mrf.mxu2 }
 0x11b   :  { %v174_v22 = vadd.f32 %v338_v20, %v173_v21 }
 0x11d   :  { %v202_v23 = vsel %vm201_vm2, %v174_v22, -inf  ;;  %v179_v24 = vsel %vm178_vm3, %v174_v22, -inf }
 0x11e   :  { %203 = vmax.xlane.f32.xlu0 %v202_v23  ;;  %180 = vmax.xlane.f32.xlu1 %v179_v24 }
 0x122   :  { %v175_v25 = vpop.f32.mrf.mxu2 }
 0x123   :  { %v176_v26 = vadd.f32 %v338_v20, %v175_v25 }
 0x125   :  { %v205_v27 = vsel %vm201_vm2, %v176_v26, -inf  ;;  %v182_v28 = vsel %vm178_vm3, %v176_v26, -inf }
 0x126   :  { %206 = vmax.xlane.f32.xlu0 %v205_v27  ;;  %183 = vmax.xlane.f32.xlu1 %v182_v28 }
 0x191   :  { %v204_v29 = vpop.xlane.xlu0 %203  ;;  %v181_v30 = vpop.xlane.xlu1 %180 }
 0x192   :  { %v208_v31 = vsub.f32 %v174_v22, %v204_v29  ;;  %v185_v32 = vsub.f32 %v174_v22, %v181_v30 }
 0x194   :  { %v210_v33 = vmul.f32 1.442695, %v208_v31  ;;  %v187_v34 = vmul.f32 1.442695, %v185_v32 }
 0x196   :  { %340 = vpow2.f32 %v210_v33 }
 0x197   :  { %342 = vpow2.f32 %v187_v34 }
 0x199   :  { %v207_v35 = vpop.xlane.xlu0 %206  ;;  %v184_v36 = vpop.xlane.xlu1 %183 }
 0x19a   :  { %v209_v37 = vsub.f32 %v176_v26, %v207_v35  ;;  %v186_v38 = vsub.f32 %v176_v26, %v184_v36 }
 0x19c   :  { %v341_v39 = vpop.eup %340  ;;  %v212_v40 = vmul.f32 1.442695, %v209_v37  ;;  %v189_v41 = vmul.f32 1.442695, %v186_v38 }
 0x19d   :  { %v343_v42 = vpop.eup %342  ;;  %216 = vrot.lane.b32.xlu2 %v341_v39, %s386_s4 }
 0x19e   :  { %344 = vpow2.f32 %v212_v40  ;;  %v191_v43 = vsel %vm178_vm3, %v343_v42, 0.0 }
 0x19f   :  { %346 = vpow2.f32 %v189_v41  ;;  %192 = vadd.xlane.f32.xlu0 %v191_v43 }
 0x1a4   :  { %v345_v44 = vpop.eup %344 }
 0x1a5   :  { %v347_v45 = vpop.eup %346  ;;  %218 = vrot.lane.b32.xlu2 %v345_v44, %s386_s4 }
 0x1a6   :  { %v194_v46 = vsel %vm178_vm3, %v347_v45, 0.0 }
 0x1a7   :  { %195 = vadd.xlane.f32.xlu1 %v194_v46 }
 0x1f7   :  { %v217_v51 = vpop.permute.xlu2 %216 }
 0x1f8   :  { %v223_v52 = vsel %vm222_vm4, %v217_v51, 0.0 }
 0x1f9   :  { %224 = vadd.xlane.f32.xlu2 %v223_v52 }
 0x1ff   :  { %v219_v53 = vpop.permute.xlu2 %218 }
 0x200   :  { %v226_v54 = vsel %vm222_vm4, %v219_v53, 0.0 }
 0x201   :  { %227 = vadd.xlane.f32.xlu0 %v226_v54 }
 0x212   :  { %v193_v55 = vpop.xlane.xlu0 %192 }
 0x213   :  { %348 = vrcp.f32 %v193_v55 }
 0x219   :  { %v349_v57 = vpop.eup %348 }
 0x21a   :  { %v196_v56 = vpop.xlane.xlu1 %195  ;;  %v199_v59 = vmul.f32 %v349_v57, %v343_v42 }
 0x21b   :  { %350 = vrcp.f32 %v196_v56 }
 0x221   :  { %v351_v58 = vpop.eup %350 }
 0x222   :  { %v200_v60 = vmul.f32 %v351_v58, %v347_v45 }
 0x224   :  { %v326_v61 = vpack.i.bf16 %v200_v60, %v199_v59 }
 0x226   :  { %327 = vrot.lane.b32.xlu1 %v326_v61, %s387_s1 }
 0x26c   :  { %v225_v62 = vpop.xlane.xlu2 %224 }
 0x26d   :  { %352 = vrcp.f32 %v225_v62 }
 0x273   :  { %v353_v0 = vpop.eup %352 }
 0x274   :  { %v228_v63 = vpop.xlane.xlu0 %227  ;;  %v231_v2 = vmul.f32 %v353_v0, %v341_v39 }
 0x275   :  { %354 = vrcp.f32 %v228_v63 }
 0x276   :  { %356 = vpow2.f32 %v72_v10 }
 0x277   :  { %358 = vpow2.f32 %v74_v11 }
 0x27b   :  { %v355_v1 = vpop.eup %354 }
 0x27c   :  { %v232_v3 = vmul.f32 %v355_v1, %v345_v44  ;;  %v357_v12 = vpop.eup %356 }
 0x27d   :  { %v359_v14 = vpop.eup %358  ;;  %v250_v17 = vsel %vm249_vm5, %v357_v12, %v67_v8 }
 0x27e   :  { %v331_v4 = vpack.i.bf16 %v232_v3, %v231_v2  ;;  %v251_v18 = vsel %vm249_vm5, %v359_v14, %v70_v9 }
 0x280   :  { %332 = vrot.lane.b32.xlu0 %v331_v4, %s387_s1 }
 0x298   :  { %v328_v13 = vpop.permute.xlu1 %327 }
 0x299   :  { %v330_v15 = vunpack.i.h.bf16 %v328_v13  ;;  %v329_v16 = vunpack.i.l.bf16 %v328_v13 }
 0x29b   :  { %v253_v22 = vsel %vm178_vm3, %v251_v18, %v330_v15  ;;  %v252_v23 = vsel %vm178_vm3, %v250_v17, %v329_v16 }
 0x2f2   :  { %v333_v19 = vpop.permute.xlu0 %332 }
 0x2f3   :  { %v335_v20 = vunpack.i.h.bf16 %v333_v19  ;;  %v334_v21 = vunpack.i.l.bf16 %v333_v19 }
 0x2f5   :  { %v255_v24 = vsel %vm254_vm6, %v252_v23, %v334_v21  ;;  %v256_v25 = vsel %vm254_vm6, %v253_v22, %v335_v20 }
 0x2f6   :  { %v258_v26 = vsel %vm257_vm7, %v255_v24, 0.0  ;;  %v259_v27 = vsel %vm257_vm7, %v256_v25, 0.0 }
 0x2f7   :  { %v319_v28 = vpack.c.bf16 %v259_v27, %v258_v26 }
 0x2f9   :  { %320 = vst [vmem:[#allocation2] sm:$0xff] %v319_v28  }
 0x2fa   :  { %276 = dma.vmem_to_hbm [thread:$0]  %s269_s10, 128, %s271_s3, [#allocation3], %s389_s13, %s389_s13, %s390_s14  }
 0x2fb   :  { %384 = dma.done.wait [#allocation3], 128  }
 0x2fc   :  { %385 = vsyncadd [#allocation3], 4294967168 }
 0x2fd   :  { %281 = vsyncpa [#allocation3], 1 }

</bundles_post_ra>
